<compile_context>
chip_gen: v6e
topology: v6e:2x2x1
jax: 0.10.0
libtpu: 0.0.40
codegen_flags: <defaults>
</compile_context>

<pallas_src>
import functools

import jax
import jax.numpy as jnp
from jax import lax
from jax.experimental import pallas as pl
from jax.experimental.pallas import tpu as pltpu


_TARGET_DMAS = 16            # total outstanding descriptors to aim for (review: 8-16)
_N_DMA_GROUPS = 2            # grid groups -> shard descriptor issue across TCs on v7x
_MIN_COL_BYTES = 4096        # don't column-split below this contiguous run per row
_VMEM_FALLBACK_BYTES = 1024  # per-row run shorter than this -> VMEM-staged path
_FALLBACK_TILE_BYTES = 2 * 1024 * 1024  # per-tile budget; safe for v7x 64 MiB VMEM


# --------------------------------------------------------------------------- #
# Kernels
# --------------------------------------------------------------------------- #
def _crop1d_dma_kernel(x_hbm, o_hbm, sems, *, crop_left, chunk_groups):
    """Pure HBM->HBM strided copies; the crop is folded into the DMA src slice."""
    gid = pl.program_id(0)
    for g, group in enumerate(chunk_groups):          # static Python loop
        def _issue(group=group):
            copies = []
            for i, (rs, nr, cs, cl) in enumerate(group):
                cp = pltpu.make_async_copy(
                    x_hbm.at[pl.ds(rs, nr), pl.ds(crop_left + cs, cl)],
                    o_hbm.at[pl.ds(rs, nr), pl.ds(cs, cl)],
                    sems.at[i],
                )
                cp.start()
                copies.append(cp)
            for cp in copies:
                cp.wait()

        pl.when(gid == g)(_issue)


def _crop1d_vmem_kernel(x_ref, o_ref, *, crop_left, out_len):
    """Short-row fallback: contiguous full-width read, in-VMEM lane shift."""
    o_ref[...] = x_ref[:, pl.ds(crop_left, out_len)]


# --------------------------------------------------------------------------- #
# Wrapper helpers
# --------------------------------------------------------------------------- #
def _build_chunks(rows, out_len, itemsize):
    """(row_start, n_rows, col_start, col_len) chunks; ~_TARGET_DMAS of them."""
    n_row = max(1, min(_TARGET_DMAS, rows))
    rb = [(r * rows) // n_row for r in range(n_row + 1)]
    row_chunks = [(rb[i], rb[i + 1] - rb[i])
                  for i in range(n_row) if rb[i + 1] > rb[i]]

    col_splits = 1
    if len(row_chunks) < _TARGET_DMAS:
        want = -(-_TARGET_DMAS // len(row_chunks))            # ceil division
        max_by_bytes = max(1, (out_len * itemsize) // _MIN_COL_BYTES)
        col_splits = max(1, min(want, max_by_bytes, out_len))

    chunks = []
    for rs, nr in row_chunks:
        cb = [(c * out_len) // col_splits for c in range(col_splits + 1)]
        for c in range(col_splits):
            if cb[c + 1] > cb[c]:
                chunks.append((rs, nr, cb[c], cb[c + 1] - cb[c]))
    return chunks


def _crop1d_hbm(x2d, crop_left, out_len):
    rows, L = x2d.shape
    orig_dtype = x2d.dtype
    itemsize = orig_dtype.itemsize

    # Bitcast-pack sub-32-bit dtypes into u32 when alignment allows: 4-byte
    # aligned source offsets + fewer, longer bursts.
    pack = 1
    if itemsize < 4:
        p = 4 // itemsize
        if L % p == 0 and crop_left % p == 0 and out_len % p == 0:
            pack = p

    if pack > 1:
        work = lax.bitcast_convert_type(
            x2d.reshape(rows, L // pack, pack), jnp.uint32)
        w_crop_left, w_out_len, w_item = crop_left // pack, out_len // pack, 4
        w_dtype = jnp.uint32
    else:
        work = x2d
        w_crop_left, w_out_len, w_item = crop_left, out_len, itemsize
        w_dtype = orig_dtype

    chunks = _build_chunks(rows, w_out_len, w_item)
    n_groups = max(1, min(_N_DMA_GROUPS, len(chunks)))
    groups = []
    for g in range(n_groups):
        lo = (g * len(chunks)) // n_groups
        hi = ((g + 1) * len(chunks)) // n_groups
        if hi > lo:
            groups.append(tuple(chunks[lo:hi]))
    groups = tuple(groups)
    max_group = max(len(grp) for grp in groups)

    kernel = functools.partial(
        _crop1d_dma_kernel, crop_left=w_crop_left, chunk_groups=groups)

    out_work = pl.pallas_call(
        kernel,
        out_shape=jax.ShapeDtypeStruct((rows, w_out_len), w_dtype),
        grid=(len(groups),),
        # Raw HBM refs: no auto-DMA, no VMEM residency, no (8,128) block rules.
        in_specs=[pl.BlockSpec(memory_space=pl.ANY)],
        out_specs=pl.BlockSpec(memory_space=pl.ANY),
        scratch_shapes=[pltpu.SemaphoreType.DMA((max_group,))],
        compiler_params=pltpu.CompilerParams(
            dimension_semantics=("parallel",),   # v7x: both TCs issue descriptors
            has_side_effects=True,               # output only written via manual DMA
        ),
        cost_estimate=pl.CostEstimate(
            flops=0, transcendentals=0,
            bytes_accessed=2 * rows * w_out_len * w_item),
    )(work)

    if pack > 1:
        out2d = lax.bitcast_convert_type(out_work, orig_dtype).reshape(rows, out_len)
    else:
        out2d = out_work
    return out2d


def _crop1d_vmem(x2d, crop_left, out_len):
    rows, L = x2d.shape
    itemsize = x2d.dtype.itemsize
    sub = {4: 8, 2: 16, 1: 32}.get(itemsize, 8)

    # Tile sizing: conservative per-tile budget so double-buffered in+out pairs
    # stay well inside v7x's 64 MiB VMEM (more headroom than v5e/v6e needs).
    tile_rows = max(1, _FALLBACK_TILE_BYTES // max(1, L * itemsize))
    if tile_rows >= rows:
        tile_rows = rows                      # full-dim block: always legal
    else:
        tile_rows = max(sub, (tile_rows // sub) * sub)

    n_tiles = pl.cdiv(rows, tile_rows)
    kernel = functools.partial(
        _crop1d_vmem_kernel, crop_left=crop_left, out_len=out_len)

    return pl.pallas_call(
        kernel,
        out_shape=jax.ShapeDtypeStruct((rows, out_len), x2d.dtype),
        grid=(n_tiles,),
        in_specs=[pl.BlockSpec((tile_rows, L), lambda i: (i, 0))],
        out_specs=pl.BlockSpec((tile_rows, out_len), lambda i: (i, 0)),
        compiler_params=pltpu.CompilerParams(
            dimension_semantics=("parallel",)),
        cost_estimate=pl.CostEstimate(
            flops=0, transcendentals=0,
            bytes_accessed=rows * (L + out_len) * itemsize),
    )(x2d)


# --------------------------------------------------------------------------- #
# Public entry point (Cropping1D.forward equivalent)
# --------------------------------------------------------------------------- #
def cropping1d(x: jax.Array, crop_size: int, *, materialize: bool = True) -> jax.Array:
    """Equivalent of PyTorch Cropping1D.forward for NCL (B, C, L) input."""
    crop_left = crop_size // 2
    crop_right = crop_size - crop_left
    B, C, L = x.shape
    out_len = L - crop_left - crop_right
    if out_len <= 0:
        raise ValueError("crop_size too large for input length")
    if crop_left == 0 and crop_right == 0:
        return x  # crop_size == 0: PyTorch returns x[:, :, 0:] == x

    if not materialize:
        # Fused path: a plain slice can fuse into the consumer and avoid the
        # 2x HBM round trip of a materializing copy — biggest possible win.
        return x[:, :, crop_left:L - crop_right]

    # Collapse (B, C) -> rows: dense row axis regardless of C; reshape of a
    # contiguous array is a free bitcast in XLA.
    rows = B * C
    x2d = x.reshape(rows, L)

    if out_len * x.dtype.itemsize < _VMEM_FALLBACK_BYTES:
        out2d = _crop1d_vmem(x2d, crop_left, out_len)
    else:
        out2d = _crop1d_hbm(x2d, crop_left, out_len)
    return out2d.reshape(B, C, out_len)


# --------------------------------------------------------------------------- #
# Self-test
# --------------------------------------------------------------------------- #
def _reference(x, crop_size):
    crop_left = crop_size // 2
    crop_right = crop_size - crop_left
    if crop_right > 0:
        return x[:, :, crop_left:-crop_right]
    return x[:, :, crop_left:]


if __name__ == "__main__":
    key = jax.random.PRNGKey(0)
    k1, k2, k3 = jax.random.split(key, 3)

    # Case 1: small spec-consistent shape -> VMEM-staged short-row path.
    x1 = jax.random.normal(k1, (2, 4, 16), dtype=jnp.float32)
    o1 = jax.block_until_ready(cropping1d(x1, 4))
    assert o1.shape == (2, 4, 12), o1.shape
    assert jnp.array_equal(o1, _reference(x1, 4)), "mismatch (vmem path)"

    # Fused (non-materializing) path sanity check.
    o1f = jax.block_until_ready(cropping1d(x1, 4, materialize=False))
    assert jnp.array_equal(o1f, _reference(x1, 4)), "mismatch (fused path)"

    # Case 2: longer rows -> HBM->HBM DMA path with row + column chunking.
    x2 = jax.random.normal(k2, (2, 4, 4096), dtype=jnp.float32)
    o2 = jax.block_until_ready(cropping1d(x2, 4))
    assert o2.shape == (2, 4, 4092), o2.shape
    assert jnp.array_equal(o2, _reference(x2, 4)), "mismatch (hbm path)"

    # Case 3: bf16 -> bitcast-packed u32 HBM->HBM DMA path.
    x3 = jax.random.normal(k3, (2, 4, 2048), dtype=jnp.bfloat16)
    o3 = jax.block_until_ready(cropping1d(x3, 8))
    assert o3.shape == (2, 4, 2040), o3.shape
    assert jnp.array_equal(o3, _reference(x3, 8)), "mismatch (packed hbm path)"

    print("KERNEL_OK")
</pallas_src>

<mosaic_0001>
module attributes {stable_mosaic.version = 11 : i64} {
  func.func @_crop1d_vmem_kernel(%arg0: i32, %arg1: memref<8x16xf32, #tpu.memory_space<vmem>>, %arg2: memref<8x12xf32, #tpu.memory_space<vmem>>) attributes {dimension_semantics = [#tpu.dimension_semantics<parallel>], iteration_bounds = array<i64: 1>, scalar_prefetch = 0 : i64, scratch_operands = 0 : i64, tpu.core_type = #tpu.core_type<tc>, window_params = [{transform_indices = @transform_0, window_bounds = array<i64: 8, 16>}, {transform_indices = @transform_1, window_bounds = array<i64: 8, 12>}]} {
    %c0 = arith.constant 0 : index
    %c2 = arith.constant 2 : index
    %0 = vector.load %arg1[%c0, %c2] : memref<8x16xf32, #tpu.memory_space<vmem>>, vector<8x12xf32>
    %c0_0 = arith.constant 0 : index
    %c0_1 = arith.constant 0 : index
    %1 = vector.load %arg2[%c0_0, %c0_1] : memref<8x12xf32, #tpu.memory_space<vmem>>, vector<8x12xf32>
    tpu.vector_store %arg2[%c0_0, %c0_1], %0 {strides = array<i32>} : memref<8x12xf32, #tpu.memory_space<vmem>>, vector<8x12xf32>,
    return
  }
  func.func @transform_0(%arg0: i32) -> (i32, i32) {
    %c0_i32 = arith.constant 0 : i32
    %c0_i32_0 = arith.constant 0 : i32
    return %arg0, %c0_i32 : i32, i32
  }
  func.func @transform_1(%arg0: i32) -> (i32, i32) {
    %c0_i32 = arith.constant 0 : i32
    %c0_i32_0 = arith.constant 0 : i32
    return %arg0, %c0_i32 : i32, i32
  }
}

</mosaic_0001>

<bundles_post_ra>
// kernel: tpu_custom_call.1
= control target key start
LH: loop header
LB: loop body
LE: loop exit
PB: predicated region body
PF: predicated region fallthrough
CT: control target
= control target key end

     0   :  { %6 = vsyncpa [#allocation3], 0  ;;  %s109_s0 = inlined_call_operand.hbm [shape: f32[8,16], index: 0, kind: input, shape index: {}]   ;;  %s110_s1 = inlined_call_operand.hbm [shape: f32[8,12], index: 1, kind: output, shape index: {}]  }
   0x1   :  { %7 = vsyncpa [#allocation4], 0  ;;  %s90_s6 = smov [#allocation2]  }
   0x2   :  { %s14_s7 = sshll.u32 %s90_s6, 4  ;;  %s15_s7 = int_to_ptr.vmem [resolvable:$true] %s14_s7 }
   0x3   :  { %s54_s8 = scalar_lea.vmem %s15_s7, 128  ;;  %p59_p1 = scmp.lt.s32.totalorder %s15_s7, %s15_s7 }
   0x4   :  { %p55_p0 = scmp.ne.s32.totalorder %s15_s7, %s54_s8  ;;  %p60_p2 = scmp.lt.s32.totalorder %s54_s8, %s54_s8 }
   0x6   :  { %p61_p3 = por %p60_p2, %p59_p1 }
   0x8   :  { %p62_p4 = pnand %p61_p3, %p55_p0 }
   0xa   :  { %65 = shalt.err (!%p62_p4)
}
   0xb   :  { %17 = dma.hbm_to_vmem [thread:$0]  %s109_s0, 128, %s15_s7, [#allocation3]  }
   0xc   :  { %86 = dma.done.wait [#allocation3], 128  }
   0xd   :  { %87 = vsyncadd [#allocation3], 4294967168  ;;  %v21_v0 = vld [vmem:[#allocation2] sm:$0xff]  ;;  %s91_s11 = smov 126   ;;  %s92_s12 = smov [#allocation5]   ;;  %vm26_vm0 = vcmask 97280  }
   0xe   :  { %23 = vrot.lane.b32.xlu0 %v21_v0, %s91_s11  ;;  %s34_s13 = sshll.u32 %s92_s12, 4  ;;  %s35_s13 = int_to_ptr.vmem [resolvable:$true] %s34_s13 }
   0xf   :  { %s66_s14 = scalar_lea.vmem %s35_s13, 128  ;;  %p71_p6 = scmp.lt.s32.totalorder %s35_s13, %s35_s13 }
  0x10   :  { %p67_p5 = scmp.ne.s32.totalorder %s35_s13, %s66_s14  ;;  %p72_p7 = scmp.lt.s32.totalorder %s66_s14, %s66_s14 }
  0x12   :  { %p73_p8 = por %p72_p7, %p71_p6 }
  0x14   :  { %p74_p9 = pnand %p73_p8, %p67_p5 }
  0x80   :  { %v24_v1 = vpop.permute.xlu0 %23 }
  0x81   :  { %27 = vst.msk [vmem:[#allocation5] sm:$0xff] %vm26_vm0, %v24_v1 }
  0x82   :  { %77 = shalt.err (!%p74_p9)
}
  0x83   :  { %37 = dma.vmem_to_hbm [thread:$0]  %s35_s13, 128, %s110_s1, [#allocation4]  }
  0x84   :  { %88 = dma.done.wait [#allocation4], 128  }
  0x85   :  { %89 = vsyncadd [#allocation4], 4294967168 }
  0x86   :  { %41 = vsyncpa [#allocation3], 1 }
  0x87   :  { %42 = vsyncpa [#allocation4], 1 }

</bundles_post_ra>
